<compile_context>
chip_gen: v5e
topology: v5e:2x2
jax: 0.10.0
libtpu: 0.0.40
codegen_flags: <defaults>
</compile_context>

<pallas_src>
import functools

import jax
import jax.numpy as jnp
from jax import lax
from jax.experimental import pallas as pl
from jax.experimental.pallas import tpu as pltpu

_LANE = 128
_SUBLANE = 8


def _round_up(x, m):
    return (x + m - 1) // m * m


def _apply_non_linearity(pre, non_linearity):
    if non_linearity == "sigmoid":
        return jax.nn.sigmoid(pre)
    if non_linearity == "tanh":
        return jnp.tanh(pre)
    if non_linearity == "relu":
        return jnp.maximum(pre, 0.0)
    return pre  # 'none' -> identity, matches the PyTorch fall-through


# --------------------------------------------------------------------------
# One-time parameter preparation (hoisted out of the forward path).
# --------------------------------------------------------------------------
def prepare_params(weight, bias, input_size, hidden_size):
    """Pack nn.Linear(weight [H, I+H], bias [H]) for the Pallas kernels.

    Returns (wx [I_pad, H_pad], wh [H_pad, H_pad], b [1, H_pad], i_pad, h_pad).
    Padded rows/cols are zero so they contribute nothing; in particular rows
    [hidden:, :] of wh are zero, which keeps nonzero padded h lanes (e.g.
    sigmoid(0)=0.5) from leaking into real outputs.
    """
    i_pad = _round_up(input_size, _LANE)
    h_pad = _round_up(hidden_size, _LANE)
    wt = jnp.transpose(weight).astype(jnp.float32)          # [I+H, H]
    wx = jnp.zeros((i_pad, h_pad), jnp.float32)
    wx = wx.at[:input_size, :hidden_size].set(wt[:input_size])
    wh = jnp.zeros((h_pad, h_pad), jnp.float32)
    wh = wh.at[:hidden_size, :hidden_size].set(wt[input_size:])
    b = jnp.zeros((1, h_pad), jnp.float32)
    b = b.at[:, :hidden_size].set(bias.astype(jnp.float32))
    return wx, wh, b, i_pad, h_pad


# --------------------------------------------------------------------------
# Single-step kernel (matches RNNController.forward) — no grid, no scratch.
# --------------------------------------------------------------------------
def _rnn_step_kernel(x_ref, h_ref, wx_ref, wh_ref, b_ref, out_ref, *,
                     non_linearity):
    pre = (jnp.dot(x_ref[...], wx_ref[...], preferred_element_type=jnp.float32)
           + jnp.dot(h_ref[...], wh_ref[...], preferred_element_type=jnp.float32)
           + b_ref[...])
    out_ref[...] = _apply_non_linearity(pre, non_linearity).astype(out_ref.dtype)


def rnn_controller_forward(inputs, prev_hidden_state, prepared_params,
                           non_linearity="tanh"):
    """Single-step forward: inputs [B, I], prev_hidden_state [B, H].

    Returns (hidden_state, (hidden_state,)) mirroring (output, RNNStateTuple).
    NOTE: for a step-by-step driver loop, keeping the state in the padded
    (b_rows, h_pad) layout between calls (input_output_aliases) would remove
    the per-call pad/slice glue; kept simple here to match the module API.
    """
    wx, wh, b, i_pad, h_pad = prepared_params
    B, input_size = inputs.shape
    hidden_size = prev_hidden_state.shape[1]
    b_rows = _round_up(B, _SUBLANE)

    x_p = jnp.zeros((b_rows, i_pad), jnp.float32).at[:B, :input_size].set(
        inputs.astype(jnp.float32))
    h_p = jnp.zeros((b_rows, h_pad), jnp.float32).at[:B, :hidden_size].set(
        prev_hidden_state.astype(jnp.float32))

    kernel = functools.partial(_rnn_step_kernel, non_linearity=non_linearity)
    out = pl.pallas_call(
        kernel,
        out_shape=jax.ShapeDtypeStruct((b_rows, h_pad), jnp.float32),
    )(x_p, h_p, wx, wh, b)

    hidden_state = out[:B, :hidden_size].astype(inputs.dtype)
    return hidden_state, (hidden_state,)


# --------------------------------------------------------------------------
# Phase 1 of the fused recurrence: parallel input projection  xW = x @ Wx + b.
# Large-M matmul (t_chunk * b_rows rows per grid step), fully parallel.
# --------------------------------------------------------------------------
def _proj_kernel(x_ref, wx_ref, b_ref, out_ref):
    out_ref[...] = (
        jnp.dot(x_ref[...], wx_ref[...], preferred_element_type=jnp.float32)
        + b_ref[...])


# --------------------------------------------------------------------------
# Phase 2: serial recurrence.  Per step only  h @ Wh + xW[t] -> non_linearity,
# with h carried as a fori_loop VALUE (vregs) inside each time chunk.
# --------------------------------------------------------------------------
def _rnn_rec_kernel(xw_ref, h0_ref, wh_ref, out_ref, h_scr, *,
                    non_linearity, t_chunk):
    c = pl.program_id(0)

    @pl.when(c == 0)
    def _():
        h_scr[...] = h0_ref[...]

    def body(t, h):
        pre = jnp.dot(h, wh_ref[...],
                      preferred_element_type=jnp.float32) + xw_ref[t]
        h_new = _apply_non_linearity(pre, non_linearity)
        out_ref[t] = h_new.astype(out_ref.dtype)
        return h_new

    h_final = lax.fori_loop(0, t_chunk, body, h_scr[...], unroll=True)
    h_scr[...] = h_final          # carry across chunk boundary only


def rnn_controller_unroll(xs, h0, prepared_params, non_linearity="tanh",
                          t_chunk=None):
    """Run T recurrent steps: xs [T, B, I], h0 [B, H] -> hs [T, B, H].

    Phase 1 precomputes xW[t] = xs@Wx + b for all steps in one parallel
    matmul; phase 2 runs the serial recurrence in time chunks with h carried
    in vregs.  Wh / h0 use constant index_maps (VMEM-resident).
    """
    wx, wh, b, i_pad, h_pad = prepared_params
    T, B, input_size = xs.shape
    hidden_size = h0.shape[1]
    b_rows = _round_up(B, _SUBLANE)

    if t_chunk is None:
        t_chunk = min(T, 16)
    num_chunks = pl.cdiv(T, t_chunk)
    T_pad = num_chunks * t_chunk
    rows_chunk = t_chunk * b_rows

    # Wrapper-side glue: lane/sublane-dense padding (sliced off below).
    xs_p = jnp.zeros((T_pad, b_rows, i_pad), jnp.float32).at[
        :T, :B, :input_size].set(xs.astype(jnp.float32))
    h0_p = jnp.zeros((b_rows, h_pad), jnp.float32).at[:B, :hidden_size].set(
        h0.astype(jnp.float32))

    # ---- Phase 1: parallel x-projection (+ bias folded in) ----------------
    xs_2d = xs_p.reshape(T_pad * b_rows, i_pad)
    xw_2d = pl.pallas_call(
        _proj_kernel,
        out_shape=jax.ShapeDtypeStruct((T_pad * b_rows, h_pad), jnp.float32),
        grid=(num_chunks,),
        in_specs=[
            pl.BlockSpec((rows_chunk, i_pad), lambda c: (c, 0)),
            pl.BlockSpec((i_pad, h_pad), lambda c: (0, 0)),   # Wx: resident
            pl.BlockSpec((1, h_pad), lambda c: (0, 0)),       # b : resident
        ],
        out_specs=pl.BlockSpec((rows_chunk, h_pad), lambda c: (c, 0)),
        compiler_params=pltpu.CompilerParams(
            dimension_semantics=("parallel",)),
    )(xs_2d, wx, b)
    xw = xw_2d.reshape(T_pad, b_rows, h_pad)

    # ---- Phase 2: serial recurrence, h @ Wh only on the critical path -----
    kernel = functools.partial(_rnn_rec_kernel,
                               non_linearity=non_linearity, t_chunk=t_chunk)
    hs = pl.pallas_call(
        kernel,
        out_shape=jax.ShapeDtypeStruct((T_pad, b_rows, h_pad), jnp.float32),
        grid=(num_chunks,),
        in_specs=[
            pl.BlockSpec((t_chunk, b_rows, h_pad), lambda c: (c, 0, 0)),
            pl.BlockSpec((b_rows, h_pad), lambda c: (0, 0)),   # h0: resident
            pl.BlockSpec((h_pad, h_pad), lambda c: (0, 0)),    # Wh: resident
        ],
        out_specs=pl.BlockSpec((t_chunk, b_rows, h_pad), lambda c: (c, 0, 0)),
        scratch_shapes=[
            pltpu.VMEM((b_rows, h_pad), jnp.float32),   # h carry across chunks
        ],
        # Recurrence: chunks must run in order.
        compiler_params=pltpu.CompilerParams(
            dimension_semantics=("arbitrary",)),
    )(xw, h0_p, wh)

    return hs[:T, :B, :hidden_size].astype(xs.dtype)


# --------------------------------------------------------------------------
# Pure-JAX references.
# --------------------------------------------------------------------------
def _reference_step(inputs, h, weight, bias, non_linearity):
    combo = jnp.concatenate([inputs, h], axis=-1)
    pre = combo @ weight.T + bias
    return _apply_non_linearity(pre, non_linearity)


def _reference_unroll(xs, h0, weight, bias, non_linearity):
    h = h0
    outs = []
    for t in range(xs.shape[0]):
        h = _reference_step(xs[t], h, weight, bias, non_linearity)
        outs.append(h)
    return jnp.stack(outs, axis=0)


if __name__ == "__main__":
    # Small shapes consistent with the module's forward signature.
    batch = 2
    input_size = 16
    hidden_size = 32
    seq_len = 8
    full_size = input_size + hidden_size

    key = jax.random.PRNGKey(0)
    k_x, k_h, k_w, k_b, k_seq = jax.random.split(key, 5)

    inputs = jax.random.normal(k_x, (batch, input_size), dtype=jnp.float32)
    prev_h = jax.random.normal(k_h, (batch, hidden_size), dtype=jnp.float32)
    xs = jax.random.normal(k_seq, (seq_len, batch, input_size),
                           dtype=jnp.float32)

    # Deterministic nn.Linear-style init: U(-1/sqrt(fan_in), 1/sqrt(fan_in)).
    bound = 1.0 / (full_size ** 0.5)
    weight = jax.random.uniform(
        k_w, (hidden_size, full_size), minval=-bound, maxval=bound,
        dtype=jnp.float32)
    bias = jax.random.uniform(
        k_b, (hidden_size,), minval=-bound, maxval=bound, dtype=jnp.float32)

    # One-time parameter prep (hoisted out of the forward path).
    prepared = prepare_params(weight, bias, input_size, hidden_size)

    # --- single step (exact RNNController.forward semantics) ---
    out, state_tuple = rnn_controller_forward(inputs, prev_h, prepared, "tanh")
    out = jax.block_until_ready(out)
    ref = _reference_step(inputs, prev_h, weight, bias, "tanh")
    assert out.shape == (batch, hidden_size)
    assert jnp.allclose(out, ref, atol=1e-5, rtol=1e-5), "step mismatch"
    assert jnp.allclose(state_tuple[0], out)

    out_r, _ = rnn_controller_forward(inputs, prev_h, prepared, "relu")
    ref_r = _reference_step(inputs, prev_h, weight, bias, "relu")
    assert jnp.allclose(jax.block_until_ready(out_r), ref_r,
                        atol=1e-5, rtol=1e-5), "relu step mismatch"

    # --- fused T-step recurrence (x-projection hoisted, h in vregs) ---
    h0 = jnp.zeros((batch, hidden_size), jnp.float32)   # init_state(): zeros
    hs = rnn_controller_unroll(xs, h0, prepared, "tanh")
    hs = jax.block_until_ready(hs)
    hs_ref = _reference_unroll(xs, h0, weight, bias, "tanh")
    assert hs.shape == (seq_len, batch, hidden_size)
    assert jnp.allclose(hs, hs_ref, atol=1e-5, rtol=1e-5), "sequence mismatch"

    # Padded-lane invariant check with a non-zero-preserving non-linearity.
    hs_s = rnn_controller_unroll(xs, h0, prepared, "sigmoid")
    hs_s = jax.block_until_ready(hs_s)
    hs_s_ref = _reference_unroll(xs, h0, weight, bias, "sigmoid")
    assert jnp.allclose(hs_s, hs_s_ref, atol=1e-5, rtol=1e-5), "sigmoid mismatch"

    print("KERNEL_OK")
</pallas_src>

<mosaic_0001>
module attributes {stable_mosaic.version = 11 : i64} {
  func.func @_rnn_step_kernel(%arg0: memref<8x128xf32, #tpu.memory_space<vmem>>, %arg1: memref<8x128xf32, #tpu.memory_space<vmem>>, %arg2: memref<128x128xf32, #tpu.memory_space<vmem>>, %arg3: memref<128x128xf32, #tpu.memory_space<vmem>>, %arg4: memref<1x128xf32, #tpu.memory_space<vmem>>, %arg5: memref<8x128xf32, #tpu.memory_space<vmem>>) attributes {dimension_semantics = [], scalar_prefetch = 0 : i64, scratch_operands = 0 : i64, tpu.core_type = #tpu.core_type<tc>} {
    %c0 = arith.constant 0 : index
    %c0_0 = arith.constant 0 : index
    %0 = vector.load %arg0[%c0, %c0_0] : memref<8x128xf32, #tpu.memory_space<vmem>>, vector<8x128xf32>
    %c0_1 = arith.constant 0 : index
    %c0_2 = arith.constant 0 : index
    %1 = vector.load %arg2[%c0_1, %c0_2] : memref<128x128xf32, #tpu.memory_space<vmem>>, vector<128x128xf32>
    %cst = arith.constant dense<0.000000e+00> : vector<8x128xf32>
    %2 = tpu.matmul %0, %1, %cst {dimension_numbers = #tpu.dot_dimension_numbers<[1], [0], [0], [1], [0, 0, 1, 1], [], []>} : vector<8x128xf32>, vector<128x128xf32>, vector<8x128xf32> -> vector<8x128xf32>
    %c0_3 = arith.constant 0 : index
    %c0_4 = arith.constant 0 : index
    %3 = vector.load %arg1[%c0_3, %c0_4] : memref<8x128xf32, #tpu.memory_space<vmem>>, vector<8x128xf32>
    %c0_5 = arith.constant 0 : index
    %c0_6 = arith.constant 0 : index
    %4 = vector.load %arg3[%c0_5, %c0_6] : memref<128x128xf32, #tpu.memory_space<vmem>>, vector<128x128xf32>
    %cst_7 = arith.constant dense<0.000000e+00> : vector<8x128xf32>
    %5 = tpu.matmul %3, %4, %cst_7 {dimension_numbers = #tpu.dot_dimension_numbers<[1], [0], [0], [1], [0, 0, 1, 1], [], []>} : vector<8x128xf32>, vector<128x128xf32>, vector<8x128xf32> -> vector<8x128xf32>
    %6 = arith.addf %2, %5 : vector<8x128xf32>
    %c0_8 = arith.constant 0 : index
    %c0_9 = arith.constant 0 : index
    %7 = vector.load %arg4[%c0_8, %c0_9] : memref<1x128xf32, #tpu.memory_space<vmem>>, vector<1x128xf32>
    %8 = vector.broadcast %7 : vector<1x128xf32> to vector<8x128xf32>
    %9 = arith.addf %6, %8 : vector<8x128xf32>
    %10 = math.tanh %9 : vector<8x128xf32>
    %c0_10 = arith.constant 0 : index
    %c0_11 = arith.constant 0 : index
    %11 = vector.load %arg5[%c0_10, %c0_11] : memref<8x128xf32, #tpu.memory_space<vmem>>, vector<8x128xf32>
    tpu.vector_store %arg5[%c0_10, %c0_11], %10 {strides = array<i32>} : memref<8x128xf32, #tpu.memory_space<vmem>>, vector<8x128xf32>,
    return
  }
}

</mosaic_0001>

<bundles_post_ra>
// kernel: tpu_custom_call.1
= control target key start
LH: loop header
LB: loop body
LE: loop exit
PB: predicated region body
PF: predicated region fallthrough
CT: control target
= control target key end

     0   :  { %10 = vsyncpa [#allocation3], 0  ;;  %s373_s0 = inlined_call_operand.hbm [shape: f32[8,128], index: 0, kind: input, shape index: {}]   ;;  %s374_s1 = inlined_call_operand.hbm [shape: f32[8,128], index: 1, kind: input, shape index: {}]   ;;  %s375_s2 = inlined_call_operand.hbm [shape: f32[128,128], index: 2, kind: input, shape index: {}]   ;;  %s376_s3 = inlined_call_operand.hbm [shape: f32[128,128], index: 3, kind: input, shape index: {}]   ;;  %s377_s4 = inlined_call_operand.vmem [shape: f32[1,128], index: 4, kind: input, shape index: {}]   ;;  %s378_s5 = inlined_call_operand.hbm [shape: f32[8,128], index: 5, kind: output, shape index: {}]  }
   0x1   :  { %11 = vsyncpa [#allocation6], 0 }
   0x2   :  { %12 = vsyncpa [#allocation9], 0  ;;  %s30_s20 = sshll.u32 %s374_s1, 4  ;;  %s31_s20 = int_to_ptr.hbm [resolvable:$true] %s30_s20 }
   0x3   :  { %13 = vsyncpa [#allocation4], 0  ;;  %s318_s21 = smov [#allocation5]   ;;  %s19_s25 = sshll.u32 %s373_s0, 4  ;;  %s20_s25 = int_to_ptr.hbm [resolvable:$true] %s19_s25 }
   0x4   :  { %s32_s22 = sshll.u32 %s318_s21, 4  ;;  %s319_s26 = smov [#allocation2]   ;;  %s33_s22 = int_to_ptr.vmem [resolvable:$true] %s32_s22 }
   0x5   :  { %35 = dma.hbm_to_vmem [thread:$0]  %s31_s20, 128, %s33_s22, [#allocation6]  }
   0x6   :  { %s21_s27 = sshll.u32 %s319_s26, 4  ;;  %s40_s30 = sshll.u32 %s375_s2, 4  ;;  %s22_s27 = int_to_ptr.vmem [resolvable:$true] %s21_s27  ;;  %s41_s30 = int_to_ptr.hbm [resolvable:$true] %s40_s30 }
   0x7   :  { %24 = dma.hbm_to_vmem [thread:$0]  %s20_s25, 128, %s22_s27, [#allocation3]  }
   0x8   :  { %s320_s1 = smov [#allocation7]   ;;  %s53_s9 = sshll.u32 %s376_s3, 4  ;;  %s54_s9 = int_to_ptr.hbm [resolvable:$true] %s53_s9 }
   0x9   :  { %s42_s6 = sshll.u32 %s320_s1, 4  ;;  %s321_s10 = smov 128   ;;  %s43_s6 = int_to_ptr.vmem [resolvable:$true] %s42_s6 }
   0xa   :  { %s322_s0 = smov 8   ;;  %s323_s11 = smov [#allocation8]  }
   0xb   :  { %48 = dma.hbm_to_vmem [thread:$0]  %s41_s30, 2048, %s43_s6, [#allocation6], %s321_s10, %s321_s10, %s322_s0  }
   0xc   :  { %s55_s12 = sshll.u32 %s323_s11, 4  ;;  %s56_s12 = int_to_ptr.vmem [resolvable:$true] %s55_s12 }
   0xd   :  { %61 = dma.hbm_to_vmem [thread:$0]  %s54_s9, 2048, %s56_s12, [#allocation9], %s321_s10, %s321_s10, %s322_s0  }
   0xe   :  { %310 = dma.done.wait [#allocation3], 128  }
   0xf   :  { %311 = vsyncadd [#allocation3], 4294967168 }
  0x10   :  { %312 = dma.done.wait [#allocation6], 2176  }
  0x11   :  { %313 = vsyncadd [#allocation6], 4294965120 }
  0x12   :  { %314 = dma.done.wait [#allocation9], 2048  }
  0x13   :  { %315 = vsyncadd [#allocation9], 4294965248  ;;  %v113_v0 = vld [vmem:[#allocation8 + $0x78] sm:$0xff]  ;;  %v112_v2 = vld [vmem:[#allocation8 + $0x70] sm:$0xff]  ;;  %s324_s13 = smov [#allocation10]   ;;  %s168_s17 = sshll.u32 %s378_s5, 4  ;;  %s169_s17 = int_to_ptr.hbm [resolvable:$true] %s168_s17 }
  0x14   :  { %v96_v1 = vld [vmem:[#allocation7 + $0x78] sm:$0xff]  ;;  %114 = vmatpush.msra.mxu0 %v113_v0  ;;  %v95_v3 = vld [vmem:[#allocation7 + $0x70] sm:$0xff]  ;;  %v111_v4 = vld [vmem:[#allocation8 + $0x68] sm:$0xff]  ;;  %s166_s14 = sshll.u32 %s324_s13, 4  ;;  %s167_s14 = int_to_ptr.vmem [resolvable:$true] %s166_s14 }
  0x15   :  { %134 = vmatpush.msra.mxu1 %v96_v1  ;;  %v94_v5 = vld [vmem:[#allocation7 + $0x68] sm:$0xff]  ;;  %v110_v6 = vld [vmem:[#allocation8 + $0x60] sm:$0xff]  ;;  %v109_v8 = vld [vmem:[#allocation8 + $0x58] sm:$0xff] }
  0x16   :  { %115 = vmatpush.msra.mxu0 %v112_v2  ;;  %v93_v7 = vld [vmem:[#allocation7 + $0x60] sm:$0xff]  ;;  %v92_v9 = vld [vmem:[#allocation7 + $0x58] sm:$0xff]  ;;  %v108_v10 = vld [vmem:[#allocation8 + $0x50] sm:$0xff] }
  0x17   :  { %135 = vmatpush.msra.mxu1 %v95_v3  ;;  %v91_v11 = vld [vmem:[#allocation7 + $0x50] sm:$0xff]  ;;  %v107_v12 = vld [vmem:[#allocation8 + $0x48] sm:$0xff]  ;;  %v106_v14 = vld [vmem:[#allocation8 + $0x40] sm:$0xff] }
  0x18   :  { %116 = vmatpush.msra.mxu0 %v111_v4  ;;  %v90_v13 = vld [vmem:[#allocation7 + $0x48] sm:$0xff]  ;;  %v89_v15 = vld [vmem:[#allocation7 + $0x40] sm:$0xff]  ;;  %v105_v16 = vld [vmem:[#allocation8 + $0x38] sm:$0xff] }
  0x19   :  { %136 = vmatpush.msra.mxu1 %v94_v5  ;;  %v88_v17 = vld [vmem:[#allocation7 + $0x38] sm:$0xff]  ;;  %v104_v18 = vld [vmem:[#allocation8 + $0x30] sm:$0xff]  ;;  %v103_v20 = vld [vmem:[#allocation8 + $0x28] sm:$0xff] }
  0x1a   :  { %117 = vmatpush.msra.mxu0 %v110_v6  ;;  %v87_v19 = vld [vmem:[#allocation7 + $0x30] sm:$0xff]  ;;  %v86_v21 = vld [vmem:[#allocation7 + $0x28] sm:$0xff]  ;;  %v102_v22 = vld [vmem:[#allocation8 + $0x20] sm:$0xff] }
  0x1b   :  { %137 = vmatpush.msra.mxu1 %v93_v7  ;;  %v85_v23 = vld [vmem:[#allocation7 + $0x20] sm:$0xff]  ;;  %v101_v24 = vld [vmem:[#allocation8 + $0x18] sm:$0xff]  ;;  %v100_v26 = vld [vmem:[#allocation8 + $0x10] sm:$0xff] }
  0x1c   :  { %118 = vmatpush.msra.mxu0 %v109_v8  ;;  %v84_v25 = vld [vmem:[#allocation7 + $0x18] sm:$0xff]  ;;  %v83_v27 = vld [vmem:[#allocation7 + $0x10] sm:$0xff]  ;;  %v99_v28 = vld [vmem:[#allocation8 + $0x8] sm:$0xff] }
  0x1d   :  { %138 = vmatpush.msra.mxu1 %v92_v9  ;;  %v82_v29 = vld [vmem:[#allocation7 + $0x8] sm:$0xff]  ;;  %v98_v30 = vld [vmem:[#allocation8] sm:$0xff]  ;;  %v97_v32 = vld [vmem:[#allocation5] sm:$0xff] }
  0x1e   :  { %119 = vmatpush.msra.mxu0 %v108_v10  ;;  %v81_v31 = vld [vmem:[#allocation7] sm:$0xff]  ;;  %v80_v33 = vld [vmem:[#allocation2] sm:$0xff] }
  0x1f   :  { %139 = vmatpush.msra.mxu1 %v91_v11  ;;  %v187_v34 = vld [vmem:[%s377_s4] ss:$0 sm:$0xff] }
  0x20   :  { %120 = vmatpush.msra.mxu0 %v107_v12 }
  0x21   :  { %140 = vmatpush.msra.mxu1 %v90_v13 }
  0x22   :  { %121 = vmatpush.msra.mxu0 %v106_v14 }
  0x23   :  { %141 = vmatpush.msra.mxu1 %v89_v15 }
  0x24   :  { %122 = vmatpush.msra.mxu0 %v105_v16 }
  0x25   :  { %142 = vmatpush.msra.mxu1 %v88_v17 }
  0x26   :  { %123 = vmatpush.msra.mxu0 %v104_v18 }
  0x27   :  { %143 = vmatpush.msra.mxu1 %v87_v19 }
  0x28   :  { %124 = vmatpush.msra.mxu0 %v103_v20 }
  0x29   :  { %144 = vmatpush.msra.mxu1 %v86_v21 }
  0x2a   :  { %125 = vmatpush.msra.mxu0 %v102_v22 }
  0x2b   :  { %145 = vmatpush.msra.mxu1 %v85_v23 }
  0x2c   :  { %126 = vmatpush.msra.mxu0 %v101_v24 }
  0x2d   :  { %146 = vmatpush.msra.mxu1 %v84_v25 }
  0x2e   :  { %127 = vmatpush.msra.mxu0 %v100_v26 }
  0x2f   :  { %147 = vmatpush.msra.mxu1 %v83_v27 }
  0x30   :  { %128 = vmatpush.msra.mxu0 %v99_v28 }
  0x31   :  { %148 = vmatpush.msra.mxu1 %v82_v29 }
  0x32   :  { %129 = vmatpush.msra.mxu0 %v98_v30 }
  0x33   :  { %149 = vmatpush.msra.mxu1 %v81_v31  ;;  %130 = vmatmul.f32.vlgmr.msra.gmra.mxu0 %v97_v32 }
  0x34   :  { %150 = vmatmul.f32.vlgmr.msra.gmra.mxu1 %v80_v33 }
  0xb0   :  { %v131_v35 = vpop.f32.mrf.mxu0 }
  0xb1   :  { %v151_v36 = vpop.f32.mrf.mxu1 }
  0xb2   :  { %v152_v37 = vadd.f32 %v151_v36, %v131_v35 }
  0xb4   :  { %v158_v38 = vadd.f32 %v187_v34, %v152_v37 }
  0xb6   :  { %188 = vtanh.f32 %v158_v38 }
  0xbc   :  { %v189_v39 = vpop.eup %188 }
  0xbd   :  { %160 = vst [vmem:[#allocation10] sm:$0xff] %v189_v39 }
  0xbe   :  { %171 = dma.vmem_to_hbm [thread:$0]  %s167_s14, 128, %s169_s17, [#allocation4]  }
  0xbf   :  { %316 = dma.done.wait [#allocation4], 128  }
  0xc0   :  { %317 = vsyncadd [#allocation4], 4294967168 }
  0xc1   :  { %176 = vsyncpa [#allocation3], 1 }
  0xc2   :  { %177 = vsyncpa [#allocation6], 1 }
  0xc3   :  { %178 = vsyncpa [#allocation9], 1 }
  0xc4   :  { %179 = vsyncpa [#allocation4], 1 }

</bundles_post_ra>
